<compile_context>
chip_gen: v6e
topology: v6e:2x2x1
jax: 0.10.0
libtpu: 0.0.40
codegen_flags: <defaults>
</compile_context>

<pallas_src>
import functools
import math

import jax
import jax.numpy as jnp
from jax.experimental import pallas as pl
from jax.experimental.pallas import tpu as pltpu


# --------------------------------------------------------------------------- #
# Kernel
# --------------------------------------------------------------------------- #
def _add_pe_kernel(x_ref, pe_ref, o_ref):
    # x_ref / o_ref: (Bblk, TR, C) block; pe_ref: (TR, C) float32 block.
    # Add in float32, cast back to the output dtype.
    x = x_ref[...].astype(jnp.float32)
    o_ref[...] = (x + pe_ref[...][None, :, :]).astype(o_ref.dtype)


# --------------------------------------------------------------------------- #
# PE table (cached, mirrors the PyTorch register_buffer construction)
# --------------------------------------------------------------------------- #
@functools.lru_cache(maxsize=32)
def _pe_table(seq_len: int, d_model: int) -> jax.Array:
    assert d_model % 2 == 0, "d_model must be even (sin/cos interleave)"
    position = jnp.arange(seq_len, dtype=jnp.float32)[:, None]          # [S,1]
    div_term = jnp.exp(
        jnp.arange(0, d_model, 2, dtype=jnp.float32)
        * (-math.log(10000.0) / d_model)
    )                                                                    # [D/2]
    angles = position * div_term                                         # [S,D/2]
    # Interleave sin (even cols) / cos (odd cols) without scatter ops.
    pe = jnp.stack([jnp.sin(angles), jnp.cos(angles)], axis=-1)
    return pe.reshape(seq_len, d_model)                                  # f32 [S,D]


# --------------------------------------------------------------------------- #
# Tiling helpers
# --------------------------------------------------------------------------- #
_MAX_LANES = 2048  # target lane-dense slab width (multiple of 128)


def _pick_lane_width(flat: int) -> int:
    """Lane width C for the flattened S*D axis (bounded, prefers /128)."""
    if flat <= _MAX_LANES:
        return flat
    for c in range(_MAX_LANES, 127, -128):
        if flat % c == 0:
            return c
    # Bounded fallback: largest divisor <= _MAX_LANES (may use masked stores,
    # but never produces an over-VMEM single block).
    for c in range(_MAX_LANES, 0, -1):
        if flat % c == 0:
            return c
    return 1


def _sublane_granularity(itemsize: int) -> int:
    """Sublane packing granularity: 8 for f32, 16 for bf16, 32 for 8-bit."""
    return max(8, 32 // max(1, itemsize))


def _pick_row_tile(rows: int, bytes_per_row: int, target_bytes: int,
                   sublane: int) -> int:
    """Row tile: multiple of `sublane` (or full extent), ~target_bytes/block."""
    if rows <= sublane:
        return rows
    tr = max(1, target_bytes // max(1, bytes_per_row))
    tr = min(tr, rows)
    tr = (tr // sublane) * sublane
    tr = max(tr, sublane)
    if tr >= rows:
        return rows
    return tr


# --------------------------------------------------------------------------- #
# Wrapper
# --------------------------------------------------------------------------- #
def positional_encoding(x: jax.Array, *, target_block_bytes: int = 4 << 20
                        ) -> jax.Array:
    """Adds sinusoidal positional encoding to x of shape [B, S, D]."""
    B, S, D = x.shape
    pe = _pe_table(S, D)                       # float32 [S, D], cached
    F = S * D
    itemsize = x.dtype.itemsize
    sub = _sublane_granularity(itemsize)

    # Lane-dense layout.
    C = _pick_lane_width(F)
    R = F // C

    # Fold small batches into the block (fewer grid steps).
    fold_batch = B <= 8
    b_blk = B if fold_batch else 1

    TR = _pick_row_tile(R, b_blk * C * itemsize, target_block_bytes, sub)
    row_tiles = pl.cdiv(R, TR)

    # Megacore: when the batch is folded, make sure there are >= 2 grid steps
    # if the row axis allows it (v7x has 2 TensorCores per chip).
    if fold_batch and row_tiles < 2 and R > sub:
        TR = max(sub, ((R // 2) // sub) * sub)
        row_tiles = pl.cdiv(R, TR)

    x3 = x.reshape(B, R, C)
    pe2 = pe.reshape(R, C)

    # Explicit VMEM limit so the default 4 MiB blocks also compile on v5e's
    # 16 MiB scoped default; capped at 48 MiB (safe on v7x's 64 MiB physical).
    x_block_bytes = b_blk * TR * C * itemsize
    pe_block_bytes = TR * C * 4
    vmem_needed = 4 * x_block_bytes + 2 * pe_block_bytes   # double-buffered
    vmem_limit = int(min(max(int(vmem_needed * 1.25), 32 << 20), 48 << 20))

    if fold_batch:
        grid = (row_tiles,)
        x_spec = pl.BlockSpec((b_blk, TR, C), lambda r: (0, r, 0))
        pe_spec = pl.BlockSpec((TR, C), lambda r: (r, 0))
        o_spec = pl.BlockSpec((b_blk, TR, C), lambda r: (0, r, 0))
        semantics = ("parallel",)
    else:
        # Row axis outermost -> PE block index constant across the inner batch
        # axis (stays VMEM-resident, not re-fetched).
        grid = (row_tiles, B)
        x_spec = pl.BlockSpec((1, TR, C), lambda r, b: (b, r, 0))
        pe_spec = pl.BlockSpec((TR, C), lambda r, b: (r, 0))
        o_spec = pl.BlockSpec((1, TR, C), lambda r, b: (b, r, 0))
        semantics = ("parallel", "parallel")

    out = pl.pallas_call(
        _add_pe_kernel,
        out_shape=jax.ShapeDtypeStruct((B, R, C), x.dtype),
        grid_spec=pl.GridSpec(
            grid=grid,
            in_specs=[x_spec, pe_spec],
            out_specs=o_spec,
        ),
        compiler_params=pltpu.CompilerParams(
            dimension_semantics=semantics,
            vmem_limit_bytes=vmem_limit,
        ),
    )(x3, pe2)

    return out.reshape(B, S, D)


# --------------------------------------------------------------------------- #
# Pure-JAX reference (mirrors the PyTorch buffer construction + forward)
# --------------------------------------------------------------------------- #
def _reference(x: jax.Array) -> jax.Array:
    B, S, D = x.shape
    position = jnp.arange(S, dtype=jnp.float32)[:, None]
    div_term = jnp.exp(
        jnp.arange(0, D, 2, dtype=jnp.float32) * (-math.log(10000.0) / D)
    )
    pe = jnp.zeros((S, D), dtype=jnp.float32)
    pe = pe.at[:, 0::2].set(jnp.sin(position * div_term))
    pe = pe.at[:, 1::2].set(jnp.cos(position * div_term))
    return x + pe[None, :, :]


if __name__ == "__main__":
    key = jax.random.PRNGKey(0)

    # Primary small case consistent with the module: [batch=2, seq=8, d_model=32].
    x1 = jax.random.normal(key, (2, 8, 32), dtype=jnp.float32)
    out1 = jax.block_until_ready(positional_encoding(x1))
    ref1 = _reference(x1)
    assert out1.shape == x1.shape
    assert jnp.allclose(out1, ref1, atol=1e-5, rtol=1e-5), (
        float(jnp.max(jnp.abs(out1 - ref1)))
    )

    # Multi-tile lane-dense path: batch folded into the block, several row
    # tiles, parallel grid even with batch == 1.
    x2 = jax.random.normal(jax.random.PRNGKey(0), (1, 512, 256),
                           dtype=jnp.float32)
    out2 = jax.block_until_ready(
        positional_encoding(x2, target_block_bytes=128 * 1024))
    ref2 = _reference(x2)
    assert jnp.allclose(out2, ref2, atol=1e-5, rtol=1e-5), (
        float(jnp.max(jnp.abs(out2 - ref2)))
    )

    # bf16 case exercising the dtype-aware sublane tiling; kernel adds in f32
    # and casts back to bf16 (PyTorch with an f32 buffer would promote to f32).
    x3 = jax.random.normal(jax.random.PRNGKey(1), (2, 64, 128),
                           dtype=jnp.bfloat16)
    out3 = jax.block_until_ready(positional_encoding(x3))
    ref3 = _reference(x3).astype(jnp.bfloat16)
    assert jnp.allclose(out3.astype(jnp.float32), ref3.astype(jnp.float32),
                        atol=1e-2, rtol=1e-2)

    print("KERNEL_OK")
</pallas_src>

<mosaic_0001>
module attributes {stable_mosaic.version = 11 : i64} {
  func.func @_add_pe_kernel(%arg0: i32, %arg1: memref<2x1x256xf32, #tpu.memory_space<vmem>>, %arg2: memref<1x256xf32, #tpu.memory_space<vmem>>, %arg3: memref<2x1x256xf32, #tpu.memory_space<vmem>>) attributes {dimension_semantics = [#tpu.dimension_semantics<parallel>], iteration_bounds = array<i64: 1>, scalar_prefetch = 0 : i64, scratch_operands = 0 : i64, tpu.core_type = #tpu.core_type<tc>, window_params = [{transform_indices = @transform_0, window_bounds = array<i64: 2, 1, 256>}, {transform_indices = @transform_1, window_bounds = array<i64: 1, 256>}, {transform_indices = @transform_2, window_bounds = array<i64: 2, 1, 256>}]} {
    %c0 = arith.constant 0 : index
    %c0_0 = arith.constant 0 : index
    %c0_1 = arith.constant 0 : index
    %0 = vector.load %arg1[%c0, %c0_0, %c0_1] : memref<2x1x256xf32, #tpu.memory_space<vmem>>, vector<2x1x256xf32>
    %c0_2 = arith.constant 0 : index
    %c0_3 = arith.constant 0 : index
    %1 = vector.load %arg2[%c0_2, %c0_3] : memref<1x256xf32, #tpu.memory_space<vmem>>, vector<1x256xf32>
    %2 = vector.shape_cast %1 : vector<1x256xf32> to vector<1x1x256xf32>
    %3 = vector.broadcast %2 : vector<1x1x256xf32> to vector<2x1x256xf32>
    %4 = arith.addf %0, %3 : vector<2x1x256xf32>
    %c0_4 = arith.constant 0 : index
    %c0_5 = arith.constant 0 : index
    %c0_6 = arith.constant 0 : index
    %5 = vector.load %arg3[%c0_4, %c0_5, %c0_6] : memref<2x1x256xf32, #tpu.memory_space<vmem>>, vector<2x1x256xf32>
    tpu.vector_store %arg3[%c0_4, %c0_5, %c0_6], %4 {strides = array<i32>} : memref<2x1x256xf32, #tpu.memory_space<vmem>>, vector<2x1x256xf32>,
    return
  }
  func.func @transform_0(%arg0: i32) -> (i32, i32, i32) {
    %c0_i32 = arith.constant 0 : i32
    %c0_i32_0 = arith.constant 0 : i32
    %c0_i32_1 = arith.constant 0 : i32
    return %c0_i32, %arg0, %c0_i32_0 : i32, i32, i32
  }
  func.func @transform_1(%arg0: i32) -> (i32, i32) {
    %c0_i32 = arith.constant 0 : i32
    %c0_i32_0 = arith.constant 0 : i32
    return %arg0, %c0_i32 : i32, i32
  }
  func.func @transform_2(%arg0: i32) -> (i32, i32, i32) {
    %c0_i32 = arith.constant 0 : i32
    %c0_i32_0 = arith.constant 0 : i32
    %c0_i32_1 = arith.constant 0 : i32
    return %c0_i32, %arg0, %c0_i32_0 : i32, i32, i32
  }
}

</mosaic_0001>

<bundles_post_ra>
// kernel: tpu_custom_call.1
= control target key start
LH: loop header
LB: loop body
LE: loop exit
PB: predicated region body
PF: predicated region fallthrough
CT: control target
= control target key end

     0   :  { %7 = vsyncpa [#allocation3], 0  ;;  %s173_s0 = inlined_call_operand.hbm [shape: f32[2,1,256], index: 0, kind: input, shape index: {}]   ;;  %s174_s1 = inlined_call_operand.hbm [shape: f32[1,256], index: 1, kind: input, shape index: {}]   ;;  %s175_s2 = inlined_call_operand.hbm [shape: f32[2,1,256], index: 2, kind: output, shape index: {}]  }
   0x1   :  { %8 = vsyncpa [#allocation6], 0 }
   0x2   :  { %9 = vsyncpa [#allocation4], 0  ;;  %s138_s9 = smov [#allocation2]  }
   0x3   :  { %s15_s10 = sshll.u32 %s138_s9, 4  ;;  %s16_s10 = int_to_ptr.vmem [resolvable:$true] %s15_s10 }
   0x4   :  { %s80_s11 = scalar_lea.vmem %s16_s10, 64  ;;  %p85_p1 = scmp.lt.s32.totalorder %s16_s10, %s16_s10 }
   0x5   :  { %p81_p0 = scmp.ne.s32.totalorder %s16_s10, %s80_s11  ;;  %p86_p2 = scmp.lt.s32.totalorder %s80_s11, %s80_s11 }
   0x7   :  { %p87_p3 = por %p86_p2, %p85_p1 }
   0x9   :  { %p88_p4 = pnand %p87_p3, %p81_p0 }
   0xb   :  { %91 = shalt.err (!%p88_p4)
}
   0xc   :  { %s139_s12 = smov 32   ;;  %s140_s13 = smov 2  }
   0xd   :  { %21 = dma.hbm_to_vmem [thread:$0]  %s173_s0, 64, %s16_s10, [#allocation3], %s139_s12, %s139_s12, %s140_s13  }
   0xe   :  { %s141_s16 = smov [#allocation5]  }
   0xf   :  { %s28_s17 = sshll.u32 %s141_s16, 4  ;;  %s29_s17 = int_to_ptr.vmem [resolvable:$true] %s28_s17 }
  0x10   :  { %s100_s18 = scalar_lea.vmem %s29_s17, 32  ;;  %p105_p6 = scmp.lt.s32.totalorder %s29_s17, %s29_s17 }
  0x11   :  { %p101_p5 = scmp.ne.s32.totalorder %s29_s17, %s100_s18  ;;  %p106_p7 = scmp.lt.s32.totalorder %s100_s18, %s100_s18 }
  0x13   :  { %p107_p8 = por %p106_p7, %p105_p6 }
  0x15   :  { %p108_p9 = pnand %p107_p8, %p101_p5 }
  0x17   :  { %111 = shalt.err (!%p108_p9)
}
  0x18   :  { %31 = dma.hbm_to_vmem [thread:$0]  %s174_s1, 32, %s29_s17, [#allocation6]  }
  0x19   :  { %132 = dma.done.wait [#allocation3], 64  }
  0x1a   :  { %133 = vsyncadd [#allocation3], 4294967232 }
  0x1b   :  { %134 = dma.done.wait [#allocation6], 32  }
  0x1c   :  { %135 = vsyncadd [#allocation6], 4294967264  ;;  %v43_v0 = vlaneseq  ;;  %s142_s0 = smov [#allocation7]   ;;  %v38_v1 = vld [vmem:[#allocation2] sm:$0x3] }
  0x1d   :  { %s54_s21 = sshll.u32 %s142_s0, 4  ;;  %v40_v2 = vld [vmem:[#allocation5] sm:$0x3]  ;;  %v39_v3 = vld [vmem:[#allocation2 + $0x2] sm:$0x3]  ;;  %s55_s21 = int_to_ptr.vmem [resolvable:$true] %s54_s21 }
  0x1e   :  { %vm45_vm0 = vcmp.lt.s32.totalorder %v43_v0, 256  ;;  %v41_v4 = vadd.f32 %v40_v2, %v38_v1  ;;  %v42_v5 = vadd.f32 %v40_v2, %v39_v3  ;;  %s112_s22 = scalar_lea.vmem %s55_s21, 64  ;;  %p117_p11 = scmp.lt.s32.totalorder %s55_s21, %s55_s21 }
  0x1f   :  { %p113_p10 = scmp.ne.s32.totalorder %s55_s21, %s112_s22  ;;  %p118_p12 = scmp.lt.s32.totalorder %s112_s22, %s112_s22 }
  0x20   :  { %47 = vst.msk [vmem:[#allocation7] sm:$0x3] %vm45_vm0, %v41_v4  ;;  %48 = vst.msk [vmem:[#allocation7 + $0x2] sm:$0x3] %vm45_vm0, %v42_v5 }
  0x21   :  { %p119_p13 = por %p118_p12, %p117_p11 }
  0x23   :  { %p120_p0 = pnand %p119_p13, %p113_p10 }
  0x25   :  { %123 = shalt.err (!%p120_p0)
}
  0x26   :  { %60 = dma.vmem_to_hbm [thread:$0]  %s55_s21, 64, %s175_s2, [#allocation4], %s139_s12, %s139_s12, %s140_s13  }
  0x27   :  { %136 = dma.done.wait [#allocation4], 64  }
  0x28   :  { %137 = vsyncadd [#allocation4], 4294967232 }
  0x29   :  { %64 = vsyncpa [#allocation3], 1 }
  0x2a   :  { %65 = vsyncpa [#allocation6], 1 }
  0x2b   :  { %66 = vsyncpa [#allocation4], 1 }

</bundles_post_ra>
